<compile_context>
chip_gen: v5e
topology: v5e:2x2
jax: 0.10.0
libtpu: 0.0.40
codegen_flags: <defaults>
</compile_context>

<pallas_src>
import numpy as np
import jax
import jax.numpy as jnp
from jax.experimental import pallas as pl
from jax.experimental.pallas import tpu as pltpu


# ----------------------------- Pallas kernel --------------------------------
def make_actor_critic_kernel(hidden2, action_size):
    """hidden2 = 2*H (fused actor+critic width), action_size = A."""

    def kernel(x_ref, w1_ref, w2_ref, w3_ref, b_ref, out_ref):
        x = x_ref[...]                                   # [TB, S]
        b = b_ref[...]                                   # [3, PW]
        b1 = b[0:1, :hidden2]                            # [1, 2H]
        b2 = b[1:2, :hidden2]                            # [1, 2H]
        b3 = b[2:3, :]                                   # [1, PW]

        # Fused actor+critic MLP: 3 matmuls instead of 6.
        h = jnp.tanh(jnp.dot(x, w1_ref[...],
                             preferred_element_type=jnp.float32) + b1)
        h = jnp.tanh(jnp.dot(h, w2_ref[...],
                             preferred_element_type=jnp.float32) + b2)
        y = jnp.dot(h, w3_ref[...],
                    preferred_element_type=jnp.float32) + b3   # [TB, PW]

        # Lanes [0, A) hold actor logits, lane A holds the critic value,
        # remaining lanes are zero padding.  Normalize logits over the
        # logical A columns only (mask padded lanes to -inf).
        col = jax.lax.broadcasted_iota(jnp.int32, y.shape, 1)
        is_logit = col < action_size
        masked = jnp.where(is_logit, y, jnp.float32(-jnp.inf))
        m = jnp.max(masked, axis=-1, keepdims=True)
        p = jnp.where(is_logit, jnp.exp(masked - m), jnp.float32(0.0))
        lse = m + jnp.log(jnp.sum(p, axis=-1, keepdims=True))

        # Lane-dense full-width store: logp in logit lanes, value (and zero
        # padding) passed through untouched.
        out_ref[...] = jnp.where(is_logit, y - lse, y)

    return kernel


# ------------------------------ Param packing --------------------------------
def pack_actor_critic(params, action_size, padded_width):
    """Pack the 12 per-layer tensors into 3 block-diagonal weights + 1 bias."""
    S, H = params["aw1"].shape
    H2 = 2 * H
    PW = padded_width

    w1 = jnp.concatenate([params["aw1"], params["cw1"]], axis=1)          # [S, 2H]

    w2 = jnp.zeros((H2, H2), jnp.float32)
    w2 = w2.at[:H, :H].set(params["aw2"]).at[H:, H:].set(params["cw2"])   # [2H, 2H]

    w3 = jnp.zeros((H2, PW), jnp.float32)
    w3 = w3.at[:H, :action_size].set(params["aw3"])
    w3 = w3.at[H:, action_size:action_size + 1].set(params["cw3"])        # [2H, PW]

    bias = jnp.zeros((3, PW), jnp.float32)
    bias = bias.at[0, :H2].set(
        jnp.concatenate([params["ab1"][0], params["cb1"][0]]))
    bias = bias.at[1, :H2].set(
        jnp.concatenate([params["ab2"][0], params["cb2"][0]]))
    bias = bias.at[2, :action_size].set(params["ab3"][0])
    bias = bias.at[2, action_size].set(params["cb3"][0, 0])
    return w1, w2, w3, bias


# ------------------------------ Wrapper --------------------------------------
def actor_critic_forward(state, params, batch_tile=None):
    """Returns (policy_log_probs [B, A], value [B])."""
    B, S = state.shape
    H = params["aw1"].shape[1]
    A = params["aw3"].shape[1]
    H2 = 2 * H
    PW = 128 * pl.cdiv(max(A + 1, H2), 128)   # lane-dense padded output width

    # Batch tile: multiple of 8 sublanes, capped so activations stay tiny
    # relative to VMEM (even against the 64 MiB v7x budget).
    if batch_tile is None:
        batch_tile = min(256, 8 * pl.cdiv(B, 8))
    TB = batch_tile
    padded_B = TB * pl.cdiv(B, TB)

    x = state.astype(jnp.float32)
    if padded_B != B:
        x = jnp.pad(x, ((0, padded_B - B), (0, 0)))

    w1, w2, w3, bias = pack_actor_critic(params, A, PW)

    kernel = make_actor_critic_kernel(H2, A)

    out = pl.pallas_call(
        kernel,
        out_shape=jax.ShapeDtypeStruct((padded_B, PW), jnp.float32),
        grid_spec=pltpu.PrefetchScalarGridSpec(
            num_scalar_prefetch=0,
            grid=(padded_B // TB,),
            in_specs=[
                pl.BlockSpec((TB, S), lambda i: (i, 0)),     # x: tiled on batch
                pl.BlockSpec((S, H2), lambda i: (0, 0)),     # w1: VMEM-resident
                pl.BlockSpec((H2, H2), lambda i: (0, 0)),    # w2: VMEM-resident
                pl.BlockSpec((H2, PW), lambda i: (0, 0)),    # w3: VMEM-resident
                pl.BlockSpec((3, PW), lambda i: (0, 0)),     # packed biases
            ],
            out_specs=pl.BlockSpec((TB, PW), lambda i: (i, 0)),
        ),
        compiler_params=pltpu.CompilerParams(
            dimension_semantics=("parallel",)),
    )(x, w1, w2, w3, bias)

    logp = out[:B, :A]          # Categorical.logits (normalized log-probs)
    value = out[:B, A]          # critic output, squeezed
    return logp, value


# ---------------------- Deterministic parameter init -------------------------
def linear_params(key, in_dim, out_dim):
    """Mimics PyTorch nn.Linear default init: U(-1/sqrt(in), 1/sqrt(in)).
    Weight is returned as (in, out) so the kernel uses x @ W + b."""
    kw, kb = jax.random.split(key)
    bound = 1.0 / np.sqrt(in_dim)
    w = jax.random.uniform(kw, (in_dim, out_dim), jnp.float32, -bound, bound)
    b = jax.random.uniform(kb, (1, out_dim), jnp.float32, -bound, bound)
    return w, b


def init_actor_critic(key, state_size, action_size, hidden_size):
    keys = jax.random.split(key, 6)
    aw1, ab1 = linear_params(keys[0], state_size, hidden_size)
    aw2, ab2 = linear_params(keys[1], hidden_size, hidden_size)
    aw3, ab3 = linear_params(keys[2], hidden_size, action_size)
    cw1, cb1 = linear_params(keys[3], state_size, hidden_size)
    cw2, cb2 = linear_params(keys[4], hidden_size, hidden_size)
    cw3, cb3 = linear_params(keys[5], hidden_size, 1)
    return dict(aw1=aw1, ab1=ab1, aw2=aw2, ab2=ab2, aw3=aw3, ab3=ab3,
                cw1=cw1, cb1=cb1, cw2=cw2, cb2=cb2, cw3=cw3, cb3=cb3)


# ------------------------------ Reference ------------------------------------
def reference_forward(state, p):
    h = jnp.tanh(state @ p["aw1"] + p["ab1"])
    h = jnp.tanh(h @ p["aw2"] + p["ab2"])
    logits = h @ p["aw3"] + p["ab3"]
    logp = logits - jax.scipy.special.logsumexp(logits, axis=-1, keepdims=True)
    g = jnp.tanh(state @ p["cw1"] + p["cb1"])
    g = jnp.tanh(g @ p["cw2"] + p["cb2"])
    value = (g @ p["cw3"] + p["cb3"])[:, 0]
    return logp, value


# -------------------------------- Main ----------------------------------------
if __name__ == "__main__":
    batch = 2
    state_size = 4
    action_size = 6
    hidden_size = 32

    key = jax.random.PRNGKey(0)
    k_params, k_state = jax.random.split(key)
    params = init_actor_critic(k_params, state_size, action_size, hidden_size)
    state = jax.random.normal(k_state, (batch, state_size), jnp.float32)

    logp, value = actor_critic_forward(state, params)
    jax.block_until_ready((logp, value))

    ref_logp, ref_value = reference_forward(state, params)
    assert logp.shape == (batch, action_size)
    assert value.shape == (batch,)
    assert np.allclose(np.asarray(logp), np.asarray(ref_logp), atol=1e-5)
    assert np.allclose(np.asarray(value), np.asarray(ref_value), atol=1e-5)

    print("KERNEL_OK")
</pallas_src>

<mosaic_0001>
module attributes {stable_mosaic.version = 11 : i64} {
  func.func @kernel(%arg0: i32, %arg1: memref<8x4xf32, #tpu.memory_space<vmem>>, %arg2: memref<4x64xf32, #tpu.memory_space<vmem>>, %arg3: memref<64x64xf32, #tpu.memory_space<vmem>>, %arg4: memref<64x128xf32, #tpu.memory_space<vmem>>, %arg5: memref<3x128xf32, #tpu.memory_space<vmem>>, %arg6: memref<8x128xf32, #tpu.memory_space<vmem>>) attributes {dimension_semantics = [#tpu.dimension_semantics<parallel>], iteration_bounds = array<i64: 1>, scalar_prefetch = 0 : i64, scratch_operands = 0 : i64, tpu.core_type = #tpu.core_type<tc>, window_params = [{transform_indices = @transform_0, window_bounds = array<i64: 8, 4>}, {pipeline_mode = #tpu.pipeline_mode<synchronous>, transform_indices = @transform_1, window_bounds = array<i64: 4, 64>}, {pipeline_mode = #tpu.pipeline_mode<synchronous>, transform_indices = @transform_2, window_bounds = array<i64: 64, 64>}, {pipeline_mode = #tpu.pipeline_mode<synchronous>, transform_indices = @transform_3, window_bounds = array<i64: 64, 128>}, {pipeline_mode = #tpu.pipeline_mode<synchronous>, transform_indices = @transform_4, window_bounds = array<i64: 3, 128>}, {transform_indices = @transform_5, window_bounds = array<i64: 8, 128>}]} {
    %c0 = arith.constant 0 : index
    %c0_0 = arith.constant 0 : index
    %0 = vector.load %arg1[%c0, %c0_0] : memref<8x4xf32, #tpu.memory_space<vmem>>, vector<8x4xf32>
    %c0_1 = arith.constant 0 : index
    %c0_2 = arith.constant 0 : index
    %1 = vector.load %arg5[%c0_1, %c0_2] : memref<3x128xf32, #tpu.memory_space<vmem>>, vector<3x128xf32>
    %2 = vector.extract_strided_slice %1 {offsets = [0, 0], sizes = [1, 64], strides = [1, 1]} : vector<3x128xf32> to vector<1x64xf32>
    %3 = vector.extract_strided_slice %1 {offsets = [1, 0], sizes = [1, 64], strides = [1, 1]} : vector<3x128xf32> to vector<1x64xf32>
    %4 = vector.extract_strided_slice %1 {offsets = [2, 0], sizes = [1, 128], strides = [1, 1]} : vector<3x128xf32> to vector<1x128xf32>
    %c0_3 = arith.constant 0 : index
    %c0_4 = arith.constant 0 : index
    %5 = vector.load %arg2[%c0_3, %c0_4] : memref<4x64xf32, #tpu.memory_space<vmem>>, vector<4x64xf32>
    %cst = arith.constant dense<0.000000e+00> : vector<8x64xf32>
    %6 = tpu.matmul %0, %5, %cst {dimension_numbers = #tpu.dot_dimension_numbers<[1], [0], [0], [1], [0, 0, 1, 1], [], []>} : vector<8x4xf32>, vector<4x64xf32>, vector<8x64xf32> -> vector<8x64xf32>
    %7 = vector.broadcast %2 : vector<1x64xf32> to vector<8x64xf32>
    %8 = arith.addf %6, %7 : vector<8x64xf32>
    %9 = math.tanh %8 : vector<8x64xf32>
    %c0_5 = arith.constant 0 : index
    %c0_6 = arith.constant 0 : index
    %10 = vector.load %arg3[%c0_5, %c0_6] : memref<64x64xf32, #tpu.memory_space<vmem>>, vector<64x64xf32>
    %cst_7 = arith.constant dense<0.000000e+00> : vector<8x64xf32>
    %11 = tpu.matmul %9, %10, %cst_7 {dimension_numbers = #tpu.dot_dimension_numbers<[1], [0], [0], [1], [0, 0, 1, 1], [], []>} : vector<8x64xf32>, vector<64x64xf32>, vector<8x64xf32> -> vector<8x64xf32>
    %12 = vector.broadcast %3 : vector<1x64xf32> to vector<8x64xf32>
    %13 = arith.addf %11, %12 : vector<8x64xf32>
    %14 = math.tanh %13 : vector<8x64xf32>
    %c0_8 = arith.constant 0 : index
    %c0_9 = arith.constant 0 : index
    %15 = vector.load %arg4[%c0_8, %c0_9] : memref<64x128xf32, #tpu.memory_space<vmem>>, vector<64x128xf32>
    %cst_10 = arith.constant dense<0.000000e+00> : vector<8x128xf32>
    %16 = tpu.matmul %14, %15, %cst_10 {dimension_numbers = #tpu.dot_dimension_numbers<[1], [0], [0], [1], [0, 0, 1, 1], [], []>} : vector<8x64xf32>, vector<64x128xf32>, vector<8x128xf32> -> vector<8x128xf32>
    %17 = vector.broadcast %4 : vector<1x128xf32> to vector<8x128xf32>
    %18 = arith.addf %16, %17 : vector<8x128xf32>
    %19 = tpu.iota {dimensions = array<i32: 1>} : vector<8x128xi32>
    %c6_i32 = arith.constant 6 : i32
    %20 = vector.broadcast %c6_i32 : i32 to vector<8x128xi32>
    %21 = arith.cmpi slt, %19, %20 : vector<8x128xi32>
    %cst_11 = arith.constant 0xFF800000 : f32
    %22 = vector.broadcast %cst_11 : f32 to vector<8x128xf32>
    %23 = arith.select %21, %18, %22 : vector<8x128xi1>, vector<8x128xf32>
    %cst_12 = arith.constant dense<0xFF800000> : vector<8xf32>
    %24 = vector.multi_reduction <maximumf>, %23, %cst_12 [1] : vector<8x128xf32> to vector<8xf32>
    %25 = vector.shape_cast %24 : vector<8xf32> to vector<8x1xf32>
    %26 = vector.broadcast %25 : vector<8x1xf32> to vector<8x128xf32>
    %27 = arith.subf %23, %26 : vector<8x128xf32>
    %28 = math.exp %27 : vector<8x128xf32>
    %cst_13 = arith.constant 0.000000e+00 : f32
    %29 = vector.broadcast %cst_13 : f32 to vector<8x128xf32>
    %30 = arith.select %21, %28, %29 : vector<8x128xi1>, vector<8x128xf32>
    %cst_14 = arith.constant dense<0.000000e+00> : vector<8xf32>
    %31 = vector.multi_reduction <add>, %30, %cst_14 [1] : vector<8x128xf32> to vector<8xf32>
    %32 = vector.shape_cast %31 : vector<8xf32> to vector<8x1xf32>
    %33 = math.log %32 : vector<8x1xf32>
    %34 = arith.addf %25, %33 : vector<8x1xf32>
    %35 = vector.broadcast %34 : vector<8x1xf32> to vector<8x128xf32>
    %36 = arith.subf %18, %35 : vector<8x128xf32>
    %37 = arith.select %21, %36, %18 : vector<8x128xi1>, vector<8x128xf32>
    %c0_15 = arith.constant 0 : index
    %c0_16 = arith.constant 0 : index
    %38 = vector.load %arg6[%c0_15, %c0_16] : memref<8x128xf32, #tpu.memory_space<vmem>>, vector<8x128xf32>
    tpu.vector_store %arg6[%c0_15, %c0_16], %37 {strides = array<i32>} : memref<8x128xf32, #tpu.memory_space<vmem>>, vector<8x128xf32>,
    return
  }
  func.func @transform_0(%arg0: i32) -> (i32, i32) {
    %c0_i32 = arith.constant 0 : i32
    %c0_i32_0 = arith.constant 0 : i32
    return %arg0, %c0_i32 : i32, i32
  }
  func.func @transform_1(%arg0: i32) -> (i32, i32) {
    %c0_i32 = arith.constant 0 : i32
    %c0_i32_0 = arith.constant 0 : i32
    %c0_i32_1 = arith.constant 0 : i32
    return %c0_i32, %c0_i32_0 : i32, i32
  }
  func.func @transform_2(%arg0: i32) -> (i32, i32) {
    %c0_i32 = arith.constant 0 : i32
    %c0_i32_0 = arith.constant 0 : i32
    %c0_i32_1 = arith.constant 0 : i32
    return %c0_i32, %c0_i32_0 : i32, i32
  }
  func.func @transform_3(%arg0: i32) -> (i32, i32) {
    %c0_i32 = arith.constant 0 : i32
    %c0_i32_0 = arith.constant 0 : i32
    %c0_i32_1 = arith.constant 0 : i32
    return %c0_i32, %c0_i32_0 : i32, i32
  }
  func.func @transform_4(%arg0: i32) -> (i32, i32) {
    %c0_i32 = arith.constant 0 : i32
    %c0_i32_0 = arith.constant 0 : i32
    %c0_i32_1 = arith.constant 0 : i32
    return %c0_i32, %c0_i32_0 : i32, i32
  }
  func.func @transform_5(%arg0: i32) -> (i32, i32) {
    %c0_i32 = arith.constant 0 : i32
    %c0_i32_0 = arith.constant 0 : i32
    return %arg0, %c0_i32 : i32, i32
  }
}

</mosaic_0001>

<bundles_post_ra>
// kernel: tpu_custom_call.1
= control target key start
LH: loop header
LB: loop body
LE: loop exit
PB: predicated region body
PF: predicated region fallthrough
CT: control target
= control target key end

     0   :  { %10 = vsyncpa [#allocation3], 0  ;;  %s341_s0 = inlined_call_operand.vmem [shape: f32[8,4], index: 0, kind: input, shape index: {}]   ;;  %s342_s1 = inlined_call_operand.vmem [shape: f32[4,64], index: 1, kind: input, shape index: {}]   ;;  %s343_s2 = inlined_call_operand.hbm [shape: f32[64,64], index: 2, kind: input, shape index: {}]   ;;  %s344_s3 = inlined_call_operand.hbm [shape: f32[64,128], index: 3, kind: input, shape index: {}]   ;;  %s345_s4 = inlined_call_operand.vmem [shape: f32[3,128], index: 4, kind: input, shape index: {}]   ;;  %s346_s5 = inlined_call_operand.hbm [shape: f32[8,128], index: 5, kind: output, shape index: {}]  }
   0x1   :  { %11 = vsyncpa [#allocation6], 0 }
   0x2   :  { %12 = vsyncpa [#allocation4], 0  ;;  %s21_s20 = sshll.u32 %s343_s2, 4  ;;  %s283_s21 = smov [#allocation2]   ;;  %s22_s20 = int_to_ptr.hbm [resolvable:$true] %s21_s20 }
   0x3   :  { %s23_s22 = sshll.u32 %s283_s21, 4  ;;  %s34_s25 = sshll.u32 %s344_s3, 4  ;;  %s24_s22 = int_to_ptr.vmem [resolvable:$true] %s23_s22  ;;  %s35_s25 = int_to_ptr.hbm [resolvable:$true] %s34_s25 }
   0x4   :  { %s284_s26 = smov 128   ;;  %s285_s27 = smov 8  }
   0x5   :  { %29 = dma.hbm_to_vmem [thread:$0]  %s22_s20, 1024, %s24_s22, [#allocation3], %s284_s26, %s284_s26, %s285_s27  }
   0x6   :  { %s286_s28 = smov [#allocation5]  }
   0x7   :  { %s36_s29 = sshll.u32 %s286_s28, 4  ;;  %s37_s29 = int_to_ptr.vmem [resolvable:$true] %s36_s29 }
   0x8   :  { %42 = dma.hbm_to_vmem [thread:$0]  %s35_s25, 1024, %s37_s29, [#allocation6], %s284_s26, %s284_s26, %s285_s27  }
   0x9   :  { %277 = dma.done.wait [#allocation3], 1024  }
   0xa   :  { %278 = vsyncadd [#allocation3], 4294966272 }
   0xb   :  { %279 = dma.done.wait [#allocation6], 1024  }
   0xc   :  { %280 = vsyncadd [#allocation6], 4294966272  ;;  %vm61_vm0 = vcmask 1043456   ;;  %vm57_vm1 = vcmask 31744   ;;  %v55_v0 = vld [vmem:[%s342_s1] sm:$0xf]  ;;  %v152_v27 = vlaneseq }
   0xd   :  { %v53_v1 = vld [vmem:[%s341_s0] sm:$0xff]  ;;  %v93_v2 = vld [vmem:[#allocation2 + $0x38] sm:$0xff]  ;;  %188 = vmatpush.msk.msra.mxu0 %vm61_vm0, %v55_v0  ;;  %v92_v3 = vld [vmem:[#allocation2 + $0x30] sm:$0xff]  ;;  %vm95_vm2 = vcmask 523264   ;;  %s177_s10 = sshll.u32 %s346_s5, 4  ;;  %s178_s10 = int_to_ptr.hbm [resolvable:$true] %s177_s10 }
   0xe   :  { %107 = vmatpush.msra.mxu1 %v93_v2  ;;  %189 = vmatmul.msk.f32.vlgmr.msra.gmra.mxu0 %vm57_vm1, %v53_v1  ;;  %v91_v4 = vld [vmem:[#allocation2 + $0x28] sm:$0xff]  ;;  %v90_v5 = vld [vmem:[#allocation2 + $0x20] sm:$0xff]  ;;  %v89_v6 = vld [vmem:[#allocation2 + $0x18] sm:$0xff]  ;;  %v153_v28 = vand.u32 127, %v152_v27 }
   0xf   :  { %v88_v7 = vld [vmem:[#allocation2 + $0x10] sm:$0xff]  ;;  %v87_v8 = vld [vmem:[#allocation2 + $0x8] sm:$0xff]  ;;  %v86_v9 = vld [vmem:[#allocation2] sm:$0xff] }
  0x10   :  { %108 = vmatpush.msra.mxu1 %v92_v3  ;;  %v127_v10 = vld [vmem:[#allocation5 + $0x38] sm:$0xff]  ;;  %v126_v11 = vld [vmem:[#allocation5 + $0x30] sm:$0xff]  ;;  %v125_v12 = vld [vmem:[#allocation5 + $0x28] sm:$0xff]  ;;  %vm154_vm3 = vcmp.lt.s32.totalorder %v153_v28, 6 }
  0x11   :  { %140 = vmatpush.msra.mxu2 %v127_v10  ;;  %v54_v13 = vld [vmem:[%s345_s4] sm:$0x7]  ;;  %v123_v19 = vld [vmem:[#allocation5 + $0x18] sm:$0xff]  ;;  %v122_v20 = vld [vmem:[#allocation5 + $0x10] sm:$0xff]  ;;  %s287_s4 = smov [#allocation7]  }
  0x12   :  { %109 = vmatpush.msra.mxu1 %v91_v4  ;;  %v56_v14 = vperm.slane %v54_v13, 0  ;;  %v124_v18 = vld [vmem:[#allocation5 + $0x20] sm:$0xff]  ;;  %v121_v21 = vld [vmem:[#allocation5 + $0x8] sm:$0xff]  ;;  %v94_v23 = vperm.slane %v54_v13, 1  ;;  %v128_v29 = vperm.slane %v54_v13, 2  ;;  %s175_s7 = sshll.u32 %s287_s4, 4  ;;  %s176_s7 = int_to_ptr.vmem [resolvable:$true] %s175_s7 }
  0x13   :  { %141 = vmatpush.msra.mxu2 %v126_v11  ;;  %v120_v22 = vld [vmem:[#allocation5] sm:$0xff] }
  0x14   :  { %110 = vmatpush.msra.mxu1 %v90_v5 }
  0x15   :  { %142 = vmatpush.msra.mxu2 %v125_v12 }
  0x16   :  { %111 = vmatpush.msra.mxu1 %v89_v6 }
  0x17   :  { %143 = vmatpush.msra.mxu2 %v124_v18 }
  0x18   :  { %112 = vmatpush.msra.mxu1 %v88_v7 }
  0x19   :  { %144 = vmatpush.msra.mxu2 %v123_v19 }
  0x1a   :  { %113 = vmatpush.msra.mxu1 %v87_v8 }
  0x1b   :  { %145 = vmatpush.msra.mxu2 %v122_v20 }
  0x1c   :  { %114 = vmatpush.msra.mxu1 %v86_v9 }
  0x1d   :  { %146 = vmatpush.msra.mxu2 %v121_v21 }
  0x1f   :  { %147 = vmatpush.msra.mxu2 %v120_v22 }
  0x8b   :  { %v82_v15 = vpop.f32.mrf.mxu0 }
  0x8c   :  { %v83_v16 = vadd.f32 %v82_v15, %v56_v14 }
  0x8e   :  { %197 = vtanh.f32 %v83_v16 }
  0x94   :  { %v198_v17 = vpop.eup %197 }
  0x95   :  { %190 = vmatmul.msk.f32.vlgmr.msra.gmra.mxu1 %vm95_vm2, %v198_v17 }
 0x112   :  { %v116_v24 = vpop.f32.mrf.mxu1 }
 0x113   :  { %v117_v25 = vadd.f32 %v116_v24, %v94_v23 }
 0x115   :  { %199 = vtanh.f32 %v117_v25 }
 0x11b   :  { %v200_v26 = vpop.eup %199 }
 0x11c   :  { %191 = vmatmul.msk.f32.vlgmr.msra.gmra.mxu2 %vm95_vm2, %v200_v26 }
 0x19f   :  { %v149_v30 = vpop.f32.mrf.mxu2 }
 0x1a0   :  { %v150_v31 = vadd.f32 %v149_v30, %v128_v29 }
 0x1a2   :  { %v155_v32 = vsel %vm154_vm3, %v150_v31, -inf }
 0x1a3   :  { %156 = vmax.xlane.f32.xlu0 %v155_v32 }
 0x216   :  { %v157_v33 = vpop.xlane.xlu0 %156 }
 0x217   :  { %v158_v34 = vsub.f32 %v155_v32, %v157_v33 }
 0x219   :  { %v159_v35 = vmul.f32 1.442695, %v158_v34 }
 0x21b   :  { %201 = vpow2.f32 %v159_v35 }
 0x221   :  { %v202_v36 = vpop.eup %201 }
 0x222   :  { %v161_v37 = vsel %vm154_vm3, %v202_v36, 0.0 }
 0x223   :  { %162 = vadd.xlane.f32.xlu0 %v161_v37 }
 0x296   :  { %v163_v38 = vpop.xlane.xlu0 %162 }
 0x297   :  { %203 = vlog2.f32 %v163_v38 }
 0x29d   :  { %v204_v39 = vpop.eup %203 }
 0x29e   :  { %v165_v40 = vmul.f32 0.6931472, %v204_v39 }
 0x2a0   :  { %v166_v41 = vadd.f32 %v165_v40, %v157_v33 }
 0x2a2   :  { %v167_v42 = vsub.f32 %v150_v31, %v166_v41 }
 0x2a4   :  { %v168_v43 = vsel %vm154_vm3, %v167_v42, %v150_v31 }
 0x2a5   :  { %169 = vst [vmem:[#allocation7] sm:$0xff] %v168_v43 }
 0x2a6   :  { %180 = dma.vmem_to_hbm [thread:$0]  %s176_s7, 128, %s178_s10, [#allocation4]  }
 0x2a7   :  { %281 = dma.done.wait [#allocation4], 128  }
 0x2a8   :  { %282 = vsyncadd [#allocation4], 4294967168 }
 0x2a9   :  { %185 = vsyncpa [#allocation3], 1 }
 0x2aa   :  { %186 = vsyncpa [#allocation6], 1 }
 0x2ab   :  { %187 = vsyncpa [#allocation4], 1 }

</bundles_post_ra>
